<compile_context>
chip_gen: v5e
topology: v5e:2x2
jax: 0.10.0
libtpu: 0.0.40
codegen_flags: <defaults>
</compile_context>

<pallas_src>
import functools
import math

import jax
import jax.numpy as jnp
from jax import lax
from jax.experimental import pallas as pl
from jax.experimental.pallas import tpu as pltpu

LN_EPS = 1e-5   # torch.nn.LayerNorm default
LANE = 128
SUBLANE = 8


def _round_up(n, m):
    return ((n + m - 1) // m) * m


def _mlp_kernel(x_ref, w1_ref, b1_ref, g_ref, be_ref, w2_ref, b2_ref, o_ref,
                *, h_true, matmul_dtype):
    # ---- l1: x @ W1 + b1 (MXU, bf16 operands / f32 accumulate by default) ----
    h = jnp.dot(x_ref[...].astype(matmul_dtype),
                w1_ref[...].astype(matmul_dtype),
                preferred_element_type=jnp.float32)
    h = h + b1_ref[...]                                   # (TM, Hp) + (1, Hp)

    # ---- LayerNorm over the true hidden width (single-pass stats) ----
    # Padded hidden lanes of h are exactly zero (zero-padded x cols / W1 rows&cols / b1),
    # so sums over the full padded width divided by the true H are exact.
    inv_h = jnp.float32(1.0 / h_true)
    mean = jnp.sum(h, axis=-1, keepdims=True) * inv_h
    msq = jnp.sum(h * h, axis=-1, keepdims=True) * inv_h
    var = jnp.maximum(msq - mean * mean, 0.0)             # guard f32 cancellation
    hn = (h - mean) * lax.rsqrt(var + LN_EPS)
    hn = hn * g_ref[...] + be_ref[...]                    # padded gamma/beta are 0 -> padded lanes stay 0

    # ---- GELU (exact erf form, matches nn.GELU() default) ----
    a = 0.5 * hn * (1.0 + lax.erf(hn * (1.0 / math.sqrt(2.0))))

    # ---- Dropout: identity in eval mode ----
    # TODO(synk): training-mode dropout (pltpu.prng_seed / prng_random_bits) not implemented.

    # ---- l2: a @ W2 + b2 (MXU) ----
    y = jnp.dot(a.astype(matmul_dtype), w2_ref[...].astype(matmul_dtype),
                preferred_element_type=jnp.float32)
    y = y + b2_ref[...]
    o_ref[...] = y.astype(o_ref.dtype)                    # lane-dense (Cout padded to 128)


def mlp_pallas(x, w1, b1, gamma, beta, w2, b2, *,
               matmul_dtype=jnp.bfloat16, tm=512):
    """x: [B, S, Cin]; weights in [in, out] layout; returns [B, S, Cout]."""
    B, S, Cin = x.shape
    H = w1.shape[1]
    Cout = w2.shape[1]
    M = B * S

    # Padded (lane-dense) feature dims.
    Cin_p = _round_up(max(Cin, LANE), LANE)
    H_p = _round_up(max(H, LANE), LANE)
    Cout_p = _round_up(max(Cout, LANE), LANE)

    # Row tiling: TM multiple of 8 (f32 sublane), capped by problem size.
    TM = min(_round_up(tm, SUBLANE), _round_up(M, SUBLANE))
    M_p = _round_up(M, TM)
    grid = (pl.cdiv(M_p, TM),)

    # Zero-pad everything once in the wrapper (padded lanes/rows contribute exact zeros).
    x2 = jnp.pad(x.reshape(M, Cin), ((0, M_p - M), (0, Cin_p - Cin)))
    w1_p = jnp.pad(w1, ((0, Cin_p - Cin), (0, H_p - H)))
    b1_p = jnp.pad(b1, ((0, 0), (0, H_p - H)))
    g_p = jnp.pad(gamma, ((0, 0), (0, H_p - H)))
    be_p = jnp.pad(beta, ((0, 0), (0, H_p - H)))
    w2_p = jnp.pad(w2, ((0, H_p - H), (0, Cout_p - Cout)))
    b2_p = jnp.pad(b2, ((0, 0), (0, Cout_p - Cout)))

    kernel = functools.partial(_mlp_kernel, h_true=H, matmul_dtype=matmul_dtype)

    # Advisory cost estimate for XLA scheduling.
    cost = pl.CostEstimate(
        flops=2 * M_p * Cin_p * H_p + 2 * M_p * H_p * Cout_p,
        transcendentals=M_p * H_p,
        bytes_accessed=4 * (M_p * Cin_p + Cin_p * H_p + 3 * H_p
                            + H_p * Cout_p + Cout_p + M_p * Cout_p),
    )

    # VMEM budget (double-buffered streaming tiles + resident weights + intermediates),
    # sized conservatively so it also fits v7x's smaller VMEM; add headroom.
    est = (2 * (TM * Cin_p + TM * Cout_p) * 4
           + 2 * (Cin_p * H_p + H_p * Cout_p + 3 * H_p + Cout_p) * 4
           + 4 * TM * H_p * 4)
    vmem_limit = int(min(max(2 * est, 16 * 1024 * 1024), 48 * 1024 * 1024))

    out2 = pl.pallas_call(
        kernel,
        out_shape=jax.ShapeDtypeStruct((M_p, Cout_p), x.dtype),
        grid_spec=pltpu.PrefetchScalarGridSpec(
            num_scalar_prefetch=0,
            grid=grid,
            in_specs=[
                pl.BlockSpec((TM, Cin_p), lambda i: (i, 0)),    # x tile (streams)
                pl.BlockSpec((Cin_p, H_p), lambda i: (0, 0)),   # W1 (resident)
                pl.BlockSpec((1, H_p), lambda i: (0, 0)),       # b1
                pl.BlockSpec((1, H_p), lambda i: (0, 0)),       # LN gamma
                pl.BlockSpec((1, H_p), lambda i: (0, 0)),       # LN beta
                pl.BlockSpec((H_p, Cout_p), lambda i: (0, 0)),  # W2 (resident)
                pl.BlockSpec((1, Cout_p), lambda i: (0, 0)),    # b2
            ],
            out_specs=pl.BlockSpec((TM, Cout_p), lambda i: (i, 0)),  # lane-dense output tile
        ),
        compiler_params=pltpu.CompilerParams(
            dimension_semantics=("parallel",),
            vmem_limit_bytes=vmem_limit,
        ),
        cost_estimate=cost,
    )(x2, w1_p, b1_p, g_p, be_p, w2_p, b2_p)

    return out2[:M, :Cout].reshape(B, S, Cout)


def mlp_reference(x, w1, b1, gamma, beta, w2, b2):
    h = jnp.einsum("bsc,ch->bsh", x, w1) + b1[0]
    mean = jnp.mean(h, axis=-1, keepdims=True)
    var = jnp.mean((h - mean) ** 2, axis=-1, keepdims=True)
    hn = (h - mean) / jnp.sqrt(var + LN_EPS)
    hn = hn * gamma[0] + beta[0]
    a = 0.5 * hn * (1.0 + lax.erf(hn / math.sqrt(2.0)))
    return jnp.einsum("bsh,ho->bso", a, w2) + b2[0]


def _make_params(key, Cin, H, Cout):
    kw1, kb1, kw2, kb2 = jax.random.split(key, 4)
    lim1 = 1.0 / math.sqrt(Cin)
    w1 = jax.random.uniform(kw1, (Cin, H), minval=-lim1, maxval=lim1, dtype=jnp.float32)
    b1 = jax.random.uniform(kb1, (1, H), minval=-lim1, maxval=lim1, dtype=jnp.float32)
    lim2 = 1.0 / math.sqrt(H)
    w2 = jax.random.uniform(kw2, (H, Cout), minval=-lim2, maxval=lim2, dtype=jnp.float32)
    b2 = jax.random.uniform(kb2, (1, Cout), minval=-lim2, maxval=lim2, dtype=jnp.float32)
    gamma = jnp.ones((1, H), dtype=jnp.float32)   # aff=True -> PyTorch default init
    beta = jnp.zeros((1, H), dtype=jnp.float32)
    return w1, b1, gamma, beta, w2, b2


if __name__ == "__main__":
    # Module config: in_channels=32, hhid=None -> hhid=32, out_channels=16,
    # drop (eval: identity), act='gelu', aff=True.
    key = jax.random.PRNGKey(0)
    kx1, kp1, kx2, kp2 = jax.random.split(key, 4)

    # --- Test 1: small shapes, f32 matmul path, tight tolerance ---
    B, S, Cin, H, Cout = 2, 8, 32, 32, 16
    x = jax.random.normal(kx1, (B, S, Cin), dtype=jnp.float32)
    params = _make_params(kp1, Cin, H, Cout)

    out_f32 = jax.block_until_ready(mlp_pallas(x, *params, matmul_dtype=jnp.float32))
    ref = mlp_reference(x, *params)
    assert out_f32.shape == (B, S, Cout)
    assert jnp.allclose(out_f32, ref, atol=1e-4, rtol=1e-4), "f32 path mismatch vs reference"

    # --- Test 2: small shapes, bf16 matmul (v6e/v7x perf path), looser tolerance ---
    out_bf16 = jax.block_until_ready(mlp_pallas(x, *params, matmul_dtype=jnp.bfloat16))
    assert jnp.allclose(out_bf16, ref, atol=3e-2, rtol=3e-2), "bf16 path mismatch vs reference"

    # --- Test 3: larger M exercising multi-step grid + row padding (M not multiple of TM) ---
    B2, S2 = 3, 400   # M = 1200 -> TM = 512, grid = (3,), 336 padded tail rows sliced off
    x_big = jax.random.normal(kx2, (B2, S2, Cin), dtype=jnp.float32)
    params_big = _make_params(kp2, Cin, H, Cout)

    out_big = jax.block_until_ready(mlp_pallas(x_big, *params_big, matmul_dtype=jnp.float32))
    ref_big = mlp_reference(x_big, *params_big)
    assert out_big.shape == (B2, S2, Cout)
    assert jnp.allclose(out_big, ref_big, atol=1e-4, rtol=1e-4), "tiled path mismatch vs reference"

    print("KERNEL_OK")
</pallas_src>

<mosaic_0001>
module attributes {stable_mosaic.version = 11 : i64} {
  func.func @_mlp_kernel(%arg0: i32, %arg1: memref<16x128xf32, #tpu.memory_space<vmem>>, %arg2: memref<128x128xf32, #tpu.memory_space<vmem>>, %arg3: memref<1x128xf32, #tpu.memory_space<vmem>>, %arg4: memref<1x128xf32, #tpu.memory_space<vmem>>, %arg5: memref<1x128xf32, #tpu.memory_space<vmem>>, %arg6: memref<128x128xf32, #tpu.memory_space<vmem>>, %arg7: memref<1x128xf32, #tpu.memory_space<vmem>>, %arg8: memref<16x128xf32, #tpu.memory_space<vmem>>) attributes {dimension_semantics = [#tpu.dimension_semantics<parallel>], iteration_bounds = array<i64: 1>, scalar_prefetch = 0 : i64, scratch_operands = 0 : i64, tpu.core_type = #tpu.core_type<tc>, window_params = [{transform_indices = @transform_0, window_bounds = array<i64: 16, 128>}, {pipeline_mode = #tpu.pipeline_mode<synchronous>, transform_indices = @transform_1, window_bounds = array<i64: 128, 128>}, {pipeline_mode = #tpu.pipeline_mode<synchronous>, transform_indices = @transform_2, window_bounds = array<i64: 1, 128>}, {pipeline_mode = #tpu.pipeline_mode<synchronous>, transform_indices = @transform_3, window_bounds = array<i64: 1, 128>}, {pipeline_mode = #tpu.pipeline_mode<synchronous>, transform_indices = @transform_4, window_bounds = array<i64: 1, 128>}, {pipeline_mode = #tpu.pipeline_mode<synchronous>, transform_indices = @transform_5, window_bounds = array<i64: 128, 128>}, {pipeline_mode = #tpu.pipeline_mode<synchronous>, transform_indices = @transform_6, window_bounds = array<i64: 1, 128>}, {transform_indices = @transform_7, window_bounds = array<i64: 16, 128>}]} {
    %c0 = arith.constant 0 : index
    %c0_0 = arith.constant 0 : index
    %0 = vector.load %arg1[%c0, %c0_0] : memref<16x128xf32, #tpu.memory_space<vmem>>, vector<16x128xf32>
    %c0_1 = arith.constant 0 : index
    %c0_2 = arith.constant 0 : index
    %1 = vector.load %arg2[%c0_1, %c0_2] : memref<128x128xf32, #tpu.memory_space<vmem>>, vector<128x128xf32>
    %cst = arith.constant dense<0.000000e+00> : vector<16x128xf32>
    %2 = tpu.matmul %0, %1, %cst {dimension_numbers = #tpu.dot_dimension_numbers<[1], [0], [0], [1], [0, 0, 1, 1], [], []>} : vector<16x128xf32>, vector<128x128xf32>, vector<16x128xf32> -> vector<16x128xf32>
    %c0_3 = arith.constant 0 : index
    %c0_4 = arith.constant 0 : index
    %3 = vector.load %arg3[%c0_3, %c0_4] : memref<1x128xf32, #tpu.memory_space<vmem>>, vector<1x128xf32>
    %4 = vector.broadcast %3 : vector<1x128xf32> to vector<16x128xf32>
    %5 = arith.addf %2, %4 : vector<16x128xf32>
    %cst_5 = arith.constant dense<0.000000e+00> : vector<16xf32>
    %6 = vector.multi_reduction <add>, %5, %cst_5 [1] : vector<16x128xf32> to vector<16xf32>
    %7 = vector.shape_cast %6 : vector<16xf32> to vector<16x1xf32>
    %cst_6 = arith.constant 3.125000e-02 : f32
    %8 = vector.broadcast %cst_6 : f32 to vector<16x1xf32>
    %9 = arith.mulf %7, %8 : vector<16x1xf32>
    %10 = arith.mulf %5, %5 : vector<16x128xf32>
    %cst_7 = arith.constant dense<0.000000e+00> : vector<16xf32>
    %11 = vector.multi_reduction <add>, %10, %cst_7 [1] : vector<16x128xf32> to vector<16xf32>
    %12 = vector.shape_cast %11 : vector<16xf32> to vector<16x1xf32>
    %cst_8 = arith.constant 3.125000e-02 : f32
    %13 = vector.broadcast %cst_8 : f32 to vector<16x1xf32>
    %14 = arith.mulf %12, %13 : vector<16x1xf32>
    %15 = arith.mulf %9, %9 : vector<16x1xf32>
    %16 = arith.subf %14, %15 : vector<16x1xf32>
    %cst_9 = arith.constant 0.000000e+00 : f32
    %17 = vector.broadcast %cst_9 : f32 to vector<16x1xf32>
    %18 = arith.maximumf %16, %17 : vector<16x1xf32>
    %19 = vector.broadcast %9 : vector<16x1xf32> to vector<16x128xf32>
    %20 = arith.subf %5, %19 : vector<16x128xf32>
    %cst_10 = arith.constant 9.99999974E-6 : f32
    %21 = vector.broadcast %cst_10 : f32 to vector<16x1xf32>
    %22 = arith.addf %18, %21 : vector<16x1xf32>
    %23 = math.rsqrt %22 : vector<16x1xf32>
    %24 = vector.broadcast %23 : vector<16x1xf32> to vector<16x128xf32>
    %25 = arith.mulf %20, %24 : vector<16x128xf32>
    %c0_11 = arith.constant 0 : index
    %c0_12 = arith.constant 0 : index
    %26 = vector.load %arg4[%c0_11, %c0_12] : memref<1x128xf32, #tpu.memory_space<vmem>>, vector<1x128xf32>
    %27 = vector.broadcast %26 : vector<1x128xf32> to vector<16x128xf32>
    %28 = arith.mulf %25, %27 : vector<16x128xf32>
    %c0_13 = arith.constant 0 : index
    %c0_14 = arith.constant 0 : index
    %29 = vector.load %arg5[%c0_13, %c0_14] : memref<1x128xf32, #tpu.memory_space<vmem>>, vector<1x128xf32>
    %30 = vector.broadcast %29 : vector<1x128xf32> to vector<16x128xf32>
    %31 = arith.addf %28, %30 : vector<16x128xf32>
    %cst_15 = arith.constant 5.000000e-01 : f32
    %32 = vector.broadcast %cst_15 : f32 to vector<16x128xf32>
    %33 = arith.mulf %32, %31 : vector<16x128xf32>
    %cst_16 = arith.constant 0.707106769 : f32
    %34 = vector.broadcast %cst_16 : f32 to vector<16x128xf32>
    %35 = arith.mulf %31, %34 : vector<16x128xf32>
    %36 = math.erf %35 : vector<16x128xf32>
    %cst_17 = arith.constant 1.000000e+00 : f32
    %37 = vector.broadcast %cst_17 : f32 to vector<16x128xf32>
    %38 = arith.addf %37, %36 : vector<16x128xf32>
    %39 = arith.mulf %33, %38 : vector<16x128xf32>
    %c0_18 = arith.constant 0 : index
    %c0_19 = arith.constant 0 : index
    %40 = vector.load %arg6[%c0_18, %c0_19] : memref<128x128xf32, #tpu.memory_space<vmem>>, vector<128x128xf32>
    %cst_20 = arith.constant dense<0.000000e+00> : vector<16x128xf32>
    %41 = tpu.matmul %39, %40, %cst_20 {dimension_numbers = #tpu.dot_dimension_numbers<[1], [0], [0], [1], [0, 0, 1, 1], [], []>} : vector<16x128xf32>, vector<128x128xf32>, vector<16x128xf32> -> vector<16x128xf32>
    %c0_21 = arith.constant 0 : index
    %c0_22 = arith.constant 0 : index
    %42 = vector.load %arg7[%c0_21, %c0_22] : memref<1x128xf32, #tpu.memory_space<vmem>>, vector<1x128xf32>
    %43 = vector.broadcast %42 : vector<1x128xf32> to vector<16x128xf32>
    %44 = arith.addf %41, %43 : vector<16x128xf32>
    %c0_23 = arith.constant 0 : index
    %c0_24 = arith.constant 0 : index
    %45 = vector.load %arg8[%c0_23, %c0_24] : memref<16x128xf32, #tpu.memory_space<vmem>>, vector<16x128xf32>
    tpu.vector_store %arg8[%c0_23, %c0_24], %44 {strides = array<i32>} : memref<16x128xf32, #tpu.memory_space<vmem>>, vector<16x128xf32>,
    return
  }
  func.func @transform_0(%arg0: i32) -> (i32, i32) {
    %c0_i32 = arith.constant 0 : i32
    %c0_i32_0 = arith.constant 0 : i32
    return %arg0, %c0_i32 : i32, i32
  }
  func.func @transform_1(%arg0: i32) -> (i32, i32) {
    %c0_i32 = arith.constant 0 : i32
    %c0_i32_0 = arith.constant 0 : i32
    %c0_i32_1 = arith.constant 0 : i32
    return %c0_i32, %c0_i32_0 : i32, i32
  }
  func.func @transform_2(%arg0: i32) -> (i32, i32) {
    %c0_i32 = arith.constant 0 : i32
    %c0_i32_0 = arith.constant 0 : i32
    %c0_i32_1 = arith.constant 0 : i32
    return %c0_i32, %c0_i32_0 : i32, i32
  }
  func.func @transform_3(%arg0: i32) -> (i32, i32) {
    %c0_i32 = arith.constant 0 : i32
    %c0_i32_0 = arith.constant 0 : i32
    %c0_i32_1 = arith.constant 0 : i32
    return %c0_i32, %c0_i32_0 : i32, i32
  }
  func.func @transform_4(%arg0: i32) -> (i32, i32) {
    %c0_i32 = arith.constant 0 : i32
    %c0_i32_0 = arith.constant 0 : i32
    %c0_i32_1 = arith.constant 0 : i32
    return %c0_i32, %c0_i32_0 : i32, i32
  }
  func.func @transform_5(%arg0: i32) -> (i32, i32) {
    %c0_i32 = arith.constant 0 : i32
    %c0_i32_0 = arith.constant 0 : i32
    %c0_i32_1 = arith.constant 0 : i32
    return %c0_i32, %c0_i32_0 : i32, i32
  }
  func.func @transform_6(%arg0: i32) -> (i32, i32) {
    %c0_i32 = arith.constant 0 : i32
    %c0_i32_0 = arith.constant 0 : i32
    %c0_i32_1 = arith.constant 0 : i32
    return %c0_i32, %c0_i32_0 : i32, i32
  }
  func.func @transform_7(%arg0: i32) -> (i32, i32) {
    %c0_i32 = arith.constant 0 : i32
    %c0_i32_0 = arith.constant 0 : i32
    return %arg0, %c0_i32 : i32, i32
  }
}

</mosaic_0001>

<bundles_post_ra>
// kernel: tpu_custom_call.1
= control target key start
LH: loop header
LB: loop body
LE: loop exit
PB: predicated region body
PF: predicated region fallthrough
CT: control target
= control target key end

     0   :  { %12 = vsyncpa [#allocation3], 0  ;;  %s606_s0 = inlined_call_operand.hbm [shape: f32[16,128], index: 0, kind: input, shape index: {}]   ;;  %s607_s1 = inlined_call_operand.hbm [shape: f32[128,128], index: 1, kind: input, shape index: {}]   ;;  %s608_s2 = inlined_call_operand.vmem [shape: f32[1,128], index: 2, kind: input, shape index: {}]   ;;  %s609_s3 = inlined_call_operand.vmem [shape: f32[1,128], index: 3, kind: input, shape index: {}]   ;;  %s610_s4 = inlined_call_operand.vmem [shape: f32[1,128], index: 4, kind: input, shape index: {}]   ;;  %s611_s5 = inlined_call_operand.hbm [shape: f32[128,128], index: 5, kind: input, shape index: {}]   ;;  %s612_s6 = inlined_call_operand.vmem [shape: f32[1,128], index: 6, kind: input, shape index: {}]   ;;  %s613_s7 = inlined_call_operand.hbm [shape: f32[16,128], index: 7, kind: output, shape index: {}]  }
   0x1   :  { %13 = vsyncpa [#allocation6], 0 }
   0x2   :  { %14 = vsyncpa [#allocation4], 0  ;;  %s32_s26 = sshll.u32 %s607_s1, 4  ;;  %s484_s27 = smov [#allocation5]   ;;  %s33_s26 = int_to_ptr.hbm [resolvable:$true] %s32_s26 }
   0x3   :  { %s34_s28 = sshll.u32 %s484_s27, 4  ;;  %s19_s8 = sshll.u32 %s606_s0, 4  ;;  %s35_s28 = int_to_ptr.vmem [resolvable:$true] %s34_s28  ;;  %s20_s8 = int_to_ptr.hbm [resolvable:$true] %s19_s8 }
   0x4   :  { %s485_s9 = smov 128   ;;  %s486_s10 = smov 8  }
   0x5   :  { %40 = dma.hbm_to_vmem [thread:$0]  %s33_s26, 2048, %s35_s28, [#allocation6], %s485_s9, %s485_s9, %s486_s10  }
   0x6   :  { %s487_s11 = smov [#allocation2]   ;;  %s51_s1 = sshll.u32 %s611_s5, 4  ;;  %s52_s1 = int_to_ptr.hbm [resolvable:$true] %s51_s1 }
   0x7   :  { %s21_s12 = sshll.u32 %s487_s11, 4  ;;  %s488_s0 = smov [#allocation7]   ;;  %s22_s12 = int_to_ptr.vmem [resolvable:$true] %s21_s12 }
   0x8   :  { %27 = dma.hbm_to_vmem [thread:$0]  %s20_s8, 256, %s22_s12, [#allocation3], %s485_s9, %s485_s9, %s486_s10  }
   0x9   :  { %s53_s15 = sshll.u32 %s488_s0, 4  ;;  %s54_s15 = int_to_ptr.vmem [resolvable:$true] %s53_s15 }
   0xa   :  { %59 = dma.hbm_to_vmem [thread:$0]  %s52_s1, 2048, %s54_s15, [#allocation6], %s485_s9, %s485_s9, %s486_s10  }
   0xb   :  { %478 = dma.done.wait [#allocation3], 256  }
   0xc   :  { %479 = vsyncadd [#allocation3], 4294967040 }
   0xd   :  { %480 = dma.done.wait [#allocation6], 4096  }
   0xe   :  { %481 = vsyncadd [#allocation6], 4294963200  ;;  %v91_v0 = vld [vmem:[#allocation5 + $0x78] sm:$0xff]  ;;  %v90_v1 = vld [vmem:[#allocation5 + $0x70] sm:$0xff]  ;;  %s489_s20 = smov [#allocation8]   ;;  %s316_s24 = sshll.u32 %s613_s7, 4  ;;  %s317_s24 = int_to_ptr.hbm [resolvable:$true] %s316_s24 }
   0xf   :  { %96 = vmatpush.msra.mxu0 %v91_v0  ;;  %332 = vmatpush.msra.mxu2 %v91_v0  ;;  %v89_v2 = vld [vmem:[#allocation5 + $0x68] sm:$0xff]  ;;  %v88_v3 = vld [vmem:[#allocation5 + $0x60] sm:$0xff]  ;;  %v87_v4 = vld [vmem:[#allocation5 + $0x58] sm:$0xff]  ;;  %s314_s21 = sshll.u32 %s489_s20, 4  ;;  %s315_s21 = int_to_ptr.vmem [resolvable:$true] %s314_s21 }
  0x10   :  { %v86_v5 = vld [vmem:[#allocation5 + $0x50] sm:$0xff]  ;;  %v85_v6 = vld [vmem:[#allocation5 + $0x48] sm:$0xff]  ;;  %v84_v7 = vld [vmem:[#allocation5 + $0x40] sm:$0xff] }
  0x11   :  { %97 = vmatpush.msra.mxu0 %v90_v1  ;;  %333 = vmatpush.msra.mxu2 %v90_v1  ;;  %v83_v8 = vld [vmem:[#allocation5 + $0x38] sm:$0xff]  ;;  %v82_v9 = vld [vmem:[#allocation5 + $0x30] sm:$0xff]  ;;  %v81_v10 = vld [vmem:[#allocation5 + $0x28] sm:$0xff] }
  0x12   :  { %v80_v11 = vld [vmem:[#allocation5 + $0x20] sm:$0xff]  ;;  %v79_v12 = vld [vmem:[#allocation5 + $0x18] sm:$0xff]  ;;  %v78_v13 = vld [vmem:[#allocation5 + $0x10] sm:$0xff] }
  0x13   :  { %98 = vmatpush.msra.mxu0 %v89_v2  ;;  %334 = vmatpush.msra.mxu2 %v89_v2  ;;  %v77_v14 = vld [vmem:[#allocation5 + $0x8] sm:$0xff]  ;;  %v76_v15 = vld [vmem:[#allocation5] sm:$0xff]  ;;  %v74_v16 = vld [vmem:[#allocation2] sm:$0xff] }
  0x14   :  { %v75_v17 = vld [vmem:[#allocation2 + $0x8] sm:$0xff]  ;;  %v370_v18 = vld [vmem:[%s608_s2] ss:$0 sm:$0xff]  ;;  %v278_v32 = vld [vmem:[#allocation7 + $0x68] sm:$0xff] }
  0x15   :  { %99 = vmatpush.msra.mxu0 %v88_v3  ;;  %335 = vmatpush.msra.mxu2 %v88_v3  ;;  %v280_v28 = vld [vmem:[#allocation7 + $0x78] sm:$0xff]  ;;  %v279_v29 = vld [vmem:[#allocation7 + $0x70] sm:$0xff]  ;;  %v277_v34 = vld [vmem:[#allocation7 + $0x60] sm:$0xff] }
  0x16   :  { %285 = vmatpush.msra.mxu1 %v280_v28  ;;  %348 = vmatpush.msra.mxu3 %v280_v28  ;;  %v276_v37 = vld [vmem:[#allocation7 + $0x58] sm:$0xff]  ;;  %v275_v40 = vld [vmem:[#allocation7 + $0x50] sm:$0xff]  ;;  %v274_v44 = vld [vmem:[#allocation7 + $0x48] sm:$0xff] }
  0x17   :  { %100 = vmatpush.msra.mxu0 %v87_v4  ;;  %336 = vmatpush.msra.mxu2 %v87_v4  ;;  %v273_v46 = vld [vmem:[#allocation7 + $0x40] sm:$0xff]  ;;  %v272_v48 = vld [vmem:[#allocation7 + $0x38] sm:$0xff]  ;;  %v271_v50 = vld [vmem:[#allocation7 + $0x30] sm:$0xff] }
  0x18   :  { %286 = vmatpush.msra.mxu1 %v279_v29  ;;  %349 = vmatpush.msra.mxu3 %v279_v29  ;;  %v270_v53 = vld [vmem:[#allocation7 + $0x28] sm:$0xff]  ;;  %v269_v55 = vld [vmem:[#allocation7 + $0x20] sm:$0xff]  ;;  %v268_v57 = vld [vmem:[#allocation7 + $0x18] sm:$0xff] }
  0x19   :  { %101 = vmatpush.msra.mxu0 %v86_v5  ;;  %337 = vmatpush.msra.mxu2 %v86_v5  ;;  %v267_v61 = vld [vmem:[#allocation7 + $0x10] sm:$0xff]  ;;  %v266_v0 = vld [vmem:[#allocation7 + $0x8] sm:$0xff]  ;;  %v265_v4 = vld [vmem:[#allocation7] sm:$0xff] }
  0x1a   :  { %287 = vmatpush.msra.mxu1 %v278_v32  ;;  %350 = vmatpush.msra.mxu3 %v278_v32  ;;  %v371_v2 = vld [vmem:[%s609_s3] ss:$0 sm:$0xff] }
  0x1b   :  { %102 = vmatpush.msra.mxu0 %v85_v6  ;;  %338 = vmatpush.msra.mxu2 %v85_v6 }
  0x1c   :  { %288 = vmatpush.msra.mxu1 %v277_v34  ;;  %351 = vmatpush.msra.mxu3 %v277_v34 }
  0x1d   :  { %103 = vmatpush.msra.mxu0 %v84_v7  ;;  %339 = vmatpush.msra.mxu2 %v84_v7  ;;  %v372_v7 = vld [vmem:[%s610_s4] ss:$0 sm:$0xff] }
  0x1e   :  { %289 = vmatpush.msra.mxu1 %v276_v37  ;;  %352 = vmatpush.msra.mxu3 %v276_v37 }
  0x1f   :  { %104 = vmatpush.msra.mxu0 %v83_v8  ;;  %340 = vmatpush.msra.mxu2 %v83_v8 }
  0x20   :  { %290 = vmatpush.msra.mxu1 %v275_v40  ;;  %353 = vmatpush.msra.mxu3 %v275_v40 }
  0x21   :  { %105 = vmatpush.msra.mxu0 %v82_v9  ;;  %341 = vmatpush.msra.mxu2 %v82_v9 }
  0x22   :  { %291 = vmatpush.msra.mxu1 %v274_v44  ;;  %354 = vmatpush.msra.mxu3 %v274_v44 }
  0x23   :  { %106 = vmatpush.msra.mxu0 %v81_v10  ;;  %342 = vmatpush.msra.mxu2 %v81_v10 }
  0x24   :  { %292 = vmatpush.msra.mxu1 %v273_v46  ;;  %355 = vmatpush.msra.mxu3 %v273_v46 }
  0x25   :  { %107 = vmatpush.msra.mxu0 %v80_v11  ;;  %343 = vmatpush.msra.mxu2 %v80_v11 }
  0x26   :  { %293 = vmatpush.msra.mxu1 %v272_v48  ;;  %356 = vmatpush.msra.mxu3 %v272_v48 }
  0x27   :  { %108 = vmatpush.msra.mxu0 %v79_v12  ;;  %344 = vmatpush.msra.mxu2 %v79_v12 }
  0x28   :  { %294 = vmatpush.msra.mxu1 %v271_v50  ;;  %357 = vmatpush.msra.mxu3 %v271_v50 }
  0x29   :  { %109 = vmatpush.msra.mxu0 %v78_v13  ;;  %345 = vmatpush.msra.mxu2 %v78_v13 }
  0x2a   :  { %295 = vmatpush.msra.mxu1 %v270_v53  ;;  %358 = vmatpush.msra.mxu3 %v270_v53 }
  0x2b   :  { %110 = vmatpush.msra.mxu0 %v77_v14  ;;  %346 = vmatpush.msra.mxu2 %v77_v14 }
  0x2c   :  { %296 = vmatpush.msra.mxu1 %v269_v55  ;;  %359 = vmatpush.msra.mxu3 %v269_v55 }
  0x2d   :  { %111 = vmatpush.msra.mxu0 %v76_v15  ;;  %347 = vmatpush.msra.mxu2 %v76_v15 }
  0x2e   :  { %112 = vmatmul.f32.vlgmr.msra.gmra.mxu0 %v74_v16  ;;  %115 = vmatmul.f32.vlgmr.msra.gmra.mxu2 %v75_v17 }
  0x2f   :  { %297 = vmatpush.msra.mxu1 %v268_v57  ;;  %360 = vmatpush.msra.mxu3 %v268_v57 }
  0x31   :  { %298 = vmatpush.msra.mxu1 %v267_v61  ;;  %361 = vmatpush.msra.mxu3 %v267_v61 }
  0x33   :  { %299 = vmatpush.msra.mxu1 %v266_v0  ;;  %362 = vmatpush.msra.mxu3 %v266_v0 }
  0x35   :  { %300 = vmatpush.msra.mxu1 %v265_v4  ;;  %363 = vmatpush.msra.mxu3 %v265_v4 }
  0xab   :  { %v113_v19 = vpop.f32.mrf.mxu0 }
  0xac   :  { %v551_v20 = vadd.f32 %v370_v18, %v113_v19 }
  0xae   :  { %119 = vadd.xlane.f32.xlu1 %v551_v20  ;;  %v125_v23 = vmul.f32 %v551_v20, %v551_v20 }
  0xb1   :  { %v116_v21 = vpop.f32.mrf.mxu2 }
  0xb2   :  { %v554_v22 = vadd.f32 %v370_v18, %v116_v21 }
  0xb4   :  { %121 = vadd.xlane.f32.xlu0 %v554_v22  ;;  %v126_v24 = vmul.f32 %v554_v22, %v554_v22 }
  0xb6   :  { %127 = vadd.xlane.f32.xlu1 %v125_v23 }
  0xbc   :  { %129 = vadd.xlane.f32.xlu0 %v126_v24 }
 0x121   :  { %v120_v25 = vpop.xlane.xlu1 %119 }
 0x122   :  { %v561_v26 = vmul.f32 0.03125, %v120_v25 }
 0x124   :  { %v133_v30 = vmul.f32 %v561_v26, %v561_v26  ;;  %v139_v1 = vsub.f32 %v551_v20, %v561_v26 }
 0x127   :  { %v122_v27 = vpop.xlane.xlu0 %121 }
 0x128   :  { %v565_v35 = vmul.f32 0.03125, %v122_v27 }
 0x129   :  { %v128_v31 = vpop.xlane.xlu1 %127 }
 0x12a   :  { %v131_v33 = vmul.f32 0.03125, %v128_v31  ;;  %v134_v41 = vmul.f32 %v565_v35, %v565_v35  ;;  %v140_v11 = vsub.f32 %v554_v22, %v565_v35 }
 0x12c   :  { %v135_v36 = vsub.f32 %v131_v33, %v133_v30 }
 0x12e   :  { %v137_v38 = vmax.f32 %v135_v36, 0.0 }
 0x12f   :  { %v130_v39 = vpop.xlane.xlu0 %129 }
 0x130   :  { %v141_v42 = vadd.f32 1e-05, %v137_v38  ;;  %v132_v43 = vmul.f32 0.03125, %v130_v39 }
 0x132   :  { %374 = vrsqrt.f32 %v141_v42  ;;  %v136_v45 = vsub.f32 %v132_v43, %v134_v41  ;;  %vm149_vm0 = vweird.f32 %v141_v42 }
 0x134   :  { %v138_v47 = vmax.f32 %v136_v45, 0.0 }
 0x136   :  { %v142_v49 = vadd.f32 1e-05, %v138_v47 }
 0x138   :  { %v375_v51 = vpop.eup %374  ;;  %376 = vrsqrt.f32 %v142_v49  ;;  %vm159_vm4 = vweird.f32 %v142_v49 }
 0x139   :  { %v144_v52 = vmul.f32 %v375_v51, %v141_v42  ;;  %vm150_vm1 = vweird.f32 %v375_v51 }
 0x13a   :  { %vm151_vm2 = vmor %vm149_vm0, %vm150_vm1 }
 0x13b   :  { %v145_v54 = vmul.f32 %v375_v51, %v144_v52 }
 0x13d   :  { %v146_v56 = vmul.f32 0.5, %v145_v54 }
 0x13e   :  { %v377_v58 = vpop.eup %376 }
 0x13f   :  { %v147_v59 = vsub.f32 1.5, %v146_v56  ;;  %v154_v60 = vmul.f32 %v377_v58, %v142_v49  ;;  %vm160_vm3 = vweird.f32 %v377_v58 }
 0x140   :  { %vm161_vm5 = vmor %vm159_vm4, %vm160_vm3 }
 0x141   :  { %v148_v62 = vmul.f32 %v375_v51, %v147_v59  ;;  %v155_v63 = vmul.f32 %v377_v58, %v154_v60 }
 0x143   :  { %v156_v3 = vmul.f32 0.5, %v155_v63  ;;  %v152_v5 = vsel %vm151_vm2, %v375_v51, %v148_v62 }
 0x144   :  { %v163_v6 = vmul.f32 %v152_v5, %v139_v1 }
 0x145   :  { %v157_v8 = vsub.f32 1.5, %v156_v3 }
 0x146   :  { %v169_v9 = vmul.f32 %v371_v2, %v163_v6 }
 0x147   :  { %v158_v10 = vmul.f32 %v377_v58, %v157_v8 }
 0x148   :  { %v579_v12 = vadd.f32 %v372_v7, %v169_v9 }
 0x149   :  { %v162_v13 = vsel %vm161_vm5, %v377_v58, %v158_v10 }
 0x14a   :  { %v582_v14 = vmul.f32 0.70710677, %v579_v12  ;;  %v164_v15 = vmul.f32 %v162_v13, %v140_v11 }
 0x14c   :  { %v181_v16 = vmul.f32 %v582_v14, %v582_v14  ;;  %v170_v17 = vmul.f32 %v371_v2, %v164_v15 }
 0x14e   :  { %v182_v18 = vmin.f32 %v181_v16, 16.0  ;;  %v586_v19 = vadd.f32 %v372_v7, %v170_v17 }
 0x150   :  { %v183_v20 = vmul.f32 2.1237322e-06, %v182_v18  ;;  %v194_v21 = vmul.f32 3.8918573e-05, %v182_v18  ;;  %v589_v23 = vmul.f32 0.70710677, %v586_v19 }
 0x152   :  { %v184_v22 = vadd.f32 0.00028619796, %v183_v20  ;;  %v195_v24 = vadd.f32 0.001143296, %v194_v21  ;;  %v221_v25 = vmul.f32 %v589_v23, %v589_v23 }
 0x154   :  { %v185_v26 = vmul.f32 %v184_v22, %v182_v18  ;;  %v196_v27 = vmul.f32 %v195_v24, %v182_v18  ;;  %v222_v28 = vmin.f32 %v221_v25, 16.0  ;;  %v177_v22 = vmul.f32 0.5, %v579_v12  ;;  %v373_v12 = vld [vmem:[%s612_s6] ss:$0 sm:$0xff] }
 0x156   :  { %v197_v29 = vadd.f32 0.014752088, %v196_v27  ;;  %v186_v30 = vadd.f32 0.0036580483, %v185_v26  ;;  %v223_v31 = vmul.f32 2.1237322e-06, %v222_v28 }
 0x157   :  { %v234_v32 = vmul.f32 3.8918573e-05, %v222_v28 }
 0x158   :  { %v198_v33 = vmul.f32 %v197_v29, %v182_v18  ;;  %v224_v34 = vadd.f32 0.00028619796, %v223_v31  ;;  %v187_v37 = vmul.f32 %v186_v30, %v182_v18  ;;  %v178_v31 = vmul.f32 0.5, %v586_v19 }
 0x159   :  { %v235_v35 = vadd.f32 0.001143296, %v234_v32 }
 0x15a   :  { %v199_v36 = vadd.f32 0.112945676, %v198_v33  ;;  %v225_v38 = vmul.f32 %v224_v34, %v222_v28  ;;  %v188_v44 = vadd.f32 0.05243302, %v187_v37 }
 0x15b   :  { %v236_v39 = vmul.f32 %v235_v35, %v222_v28 }
 0x15c   :  { %v200_v40 = vmul.f32 %v199_v36, %v182_v18  ;;  %v226_v43 = vadd.f32 0.0036580483, %v225_v38  ;;  %v189_v50 = vmul.f32 %v188_v44, %v182_v18 }
 0x15d   :  { %v237_v41 = vadd.f32 0.014752088, %v236_v39 }
 0x15e   :  { %v201_v42 = vadd.f32 0.4994258, %v200_v40  ;;  %v227_v49 = vmul.f32 %v226_v43, %v222_v28  ;;  %v190_v54 = vadd.f32 0.18741608, %v189_v50 }
 0x15f   :  { %v238_v45 = vmul.f32 %v237_v41, %v222_v28 }
 0x160   :  { %v202_v46 = vmul.f32 %v201_v42, %v182_v18  ;;  %v228_v53 = vadd.f32 0.05243302, %v227_v49  ;;  %v191_v59 = vmul.f32 %v190_v54, %v182_v18 }
 0x161   :  { %v239_v47 = vadd.f32 0.112945676, %v238_v45 }
 0x162   :  { %v203_v48 = vadd.f32 1.0, %v202_v46  ;;  %v229_v58 = vmul.f32 %v228_v53, %v222_v28  ;;  %v192_v0 = vadd.f32 1.1283791, %v191_v59 }
 0x163   :  { %v240_v51 = vmul.f32 %v239_v47, %v222_v28 }
 0x164   :  { %378 = vrcp.f32 %v203_v48  ;;  %v215_v62 = vand.u32 2147483648, %v203_v48  ;;  %v230_v63 = vadd.f32 0.18741608, %v229_v58  ;;  %v213_v2 = vand.u32 2147483647, %v203_v48 }
 0x165   :  { %v241_v52 = vadd.f32 0.4994258, %v240_v51  ;;  %vm209_vm7 = vweird.f32 %v203_v48  ;;  %v193_v8 = vmul.f32 %v192_v0, %v582_v14 }
 0x166   :  { %v216_v5 = vor.u32 1.1754944e-38, %v215_v62  ;;  %v231_v6 = vmul.f32 %v230_v63, %v222_v28  ;;  %vm214_vm9 = vcmp.eq.f32.partialorder %v213_v2, 8.507059e+37 }
 0x167   :  { %v242_v55 = vmul.f32 %v241_v52, %v222_v28 }
 0x168   :  { %v232_v16 = vadd.f32 1.1283791, %v231_v6 }
 0x169   :  { %v243_v56 = vadd.f32 1.0, %v242_v55 }
 0x16a   :  { %v379_v57 = vpop.eup %378  ;;  %v233_v14 = vmul.f32 %v232_v16, %v589_v23 }
 0x16b   :  { %v205_v60 = vmul.f32 %v379_v57, %v203_v48  ;;  %380 = vrcp.f32 %v243_v56  ;;  %vm210_vm6 = vweird.f32 %v379_v57  ;;  %v255_v15 = vand.u32 2147483648, %v243_v56 }
 0x16c   :  { %vm211_vm8 = vmor %vm209_vm7, %vm210_vm6  ;;  %v253_v18 = vand.u32 2147483647, %v243_v56  ;;  %vm249_vm11 = vweird.f32 %v243_v56 }
 0x16d   :  { %v206_v61 = vsub.f32 1.0, %v205_v60  ;;  %v256_v25 = vor.u32 1.1754944e-38, %v255_v15 }
 0x16e   :  { %vm254_vm13 = vcmp.eq.f32.partialorder %v253_v18, 8.507059e+37 }
 0x16f   :  { %v207_v1 = vmul.f32 %v379_v57, %v206_v61 }
 0x171   :  { %v381_v3 = vpop.eup %380  ;;  %v208_v4 = vadd.f32 %v379_v57, %v207_v1 }
 0x172   :  { %v245_v7 = vmul.f32 %v381_v3, %v243_v56  ;;  %vm250_vm10 = vweird.f32 %v381_v3 }
 0x173   :  { %v212_v9 = vsel %vm211_vm8, %v379_v57, %v208_v4  ;;  %vm251_vm12 = vmor %vm249_vm11, %vm250_vm10 }
 0x174   :  { %v217_v10 = vsel %vm214_vm9, %v216_v5, %v212_v9  ;;  %v246_v11 = vsub.f32 1.0, %v245_v7 }
 0x175   :  { %v218_v13 = vmul.f32 %v217_v10, %v193_v8 }
 0x176   :  { %v247_v17 = vmul.f32 %v381_v3, %v246_v11 }
 0x177   :  { %v330_v20 = vclamps-f32 %v218_v13, 1.0 }
 0x178   :  { %v248_v21 = vadd.f32 %v381_v3, %v247_v17 }
 0x179   :  { %v261_v24 = vadd.f32 1.0, %v330_v20 }
 0x17a   :  { %v252_v26 = vsel %vm251_vm12, %v381_v3, %v248_v21 }
 0x17b   :  { %v263_v27 = vmul.f32 %v261_v24, %v177_v22  ;;  %v257_v28 = vsel %vm254_vm13, %v256_v25, %v252_v26 }
 0x17c   :  { %v258_v29 = vmul.f32 %v257_v28, %v233_v14 }
 0x17d   :  { %301 = vmatmul.f32.vlgmr.msra.gmra.mxu1 %v263_v27 }
 0x17e   :  { %v331_v30 = vclamps-f32 %v258_v29, 1.0 }
 0x180   :  { %v262_v32 = vadd.f32 1.0, %v331_v30 }
 0x182   :  { %v264_v33 = vmul.f32 %v262_v32, %v178_v31 }
 0x184   :  { %304 = vmatmul.f32.vlgmr.msra.gmra.mxu3 %v264_v33 }
 0x1fa   :  { %v302_v34 = vpop.f32.mrf.mxu1 }
 0x1fb   :  { %v303_v35 = vadd.f32 %v373_v12, %v302_v34 }
 0x1fd   :  { %308 = vst [vmem:[#allocation8] sm:$0xff] %v303_v35 }
 0x207   :  { %v305_v23 = vpop.f32.mrf.mxu3 }
 0x208   :  { %v306_v36 = vadd.f32 %v373_v12, %v305_v23 }
 0x20a   :  { %309 = vst [vmem:[#allocation8 + $0x8] sm:$0xff] %v306_v36 }
 0x20b   :  { %322 = dma.vmem_to_hbm [thread:$0]  %s315_s21, 256, %s317_s24, [#allocation4], %s485_s9, %s485_s9, %s486_s10  }
 0x20c   :  { %482 = dma.done.wait [#allocation4], 256  }
 0x20d   :  { %483 = vsyncadd [#allocation4], 4294967040 }
 0x20e   :  { %327 = vsyncpa [#allocation3], 1 }
 0x20f   :  { %328 = vsyncpa [#allocation6], 1 }
 0x210   :  { %329 = vsyncpa [#allocation4], 1 }

</bundles_post_ra>
